<compile_context>
chip_gen: v7x
topology: tpu7x:2x2x1
jax: 0.10.0
libtpu: 0.0.40
codegen_flags: <defaults>
</compile_context>

<pallas_src>
import functools

import jax
import jax.numpy as jnp
import numpy as np
from jax.experimental import pallas as pl
from jax.experimental.pallas import tpu as pltpu

LN_EPS = 1e-5


def _round_up(a, b):
    return (a + b - 1) // b * b


def audio_proj_kernel(x_ref, w1_ref, b1_ref, w2_ref, b2_ref, w3_ref, b3_ref,
                      g_ref, beta_ref, o_ref, acc_ref):
    """Fused proj1(+relu) / proj2(+relu) / proj3 / LayerNorm.

    Grid = (batch_tiles, k_tiles).  k is the proj1 contraction (reduction)
    axis; acc_ref is a per-batch-tile f32 accumulator of shape (tb, D1).
    """
    k = pl.program_id(1)

    @pl.when(k == 0)
    def _():
        acc_ref[...] = jnp.zeros_like(acc_ref)

    # Partial proj1: bf16 inputs, f32 accumulation on the MXU.
    acc_ref[...] += jnp.dot(x_ref[...], w1_ref[...],
                            preferred_element_type=jnp.float32)

    @pl.when(k == pl.num_programs(1) - 1)
    def _():
        h1 = jnp.maximum(acc_ref[...] + b1_ref[...], 0.0)
        h2 = jnp.dot(h1.astype(w2_ref.dtype), w2_ref[...],
                     preferred_element_type=jnp.float32) + b2_ref[...]
        h2 = jnp.maximum(h2, 0.0)
        y = jnp.dot(h2.astype(w3_ref.dtype), w3_ref[...],
                    preferred_element_type=jnp.float32) + b3_ref[...]
        # LayerNorm over the last dim (eps=1e-5, affine), all in f32.
        mean = jnp.mean(y, axis=-1, keepdims=True)
        var = jnp.mean((y - mean) ** 2, axis=-1, keepdims=True)
        y_n = (y - mean) * jax.lax.rsqrt(var + LN_EPS)
        o_ref[...] = (y_n * g_ref[...] + beta_ref[...]).astype(o_ref.dtype)


@functools.partial(jax.jit, static_argnames=("tk", "tb"))
def audio_proj_forward(audio_embeds, params, *, tk=1024, tb=8):
    """audio_embeds: (B, seq_len, blocks, channels) -> (B, output_dim)."""
    B = audio_embeds.shape[0]
    x = audio_embeds.reshape(B, -1).astype(jnp.float32)
    K = x.shape[1]
    D1 = params["w1"].shape[1]
    D2 = params["w2"].shape[1]
    Dout = params["w3"].shape[1]

    # --- tile sizing (zero padding is exact for the matmul / sliced off) ---
    tk = max(128, _round_up(min(tk, _round_up(K, 128)), 128))   # lane-aligned K tile
    K_pad = _round_up(K, tk)
    B_pad = _round_up(B, 8)
    tb = min(_round_up(tb, 8), B_pad)
    B_pad = _round_up(B_pad, tb)
    grid = (B_pad // tb, K_pad // tk)

    # --- operand prep: bf16 matmul inputs, f32 small vectors ---
    x_p = jnp.zeros((B_pad, K_pad), jnp.bfloat16).at[:B, :K].set(
        x.astype(jnp.bfloat16))
    w1_p = jnp.zeros((K_pad, D1), jnp.bfloat16).at[:K, :].set(
        params["w1"].astype(jnp.bfloat16))
    w2_bf = params["w2"].astype(jnp.bfloat16)
    w3_bf = params["w3"].astype(jnp.bfloat16)
    b1_row = params["b1"].reshape(1, D1).astype(jnp.float32)
    b2_row = params["b2"].reshape(1, D2).astype(jnp.float32)
    b3_row = params["b3"].reshape(1, Dout).astype(jnp.float32)
    g_row = params["gamma"].reshape(1, Dout).astype(jnp.float32)
    beta_row = params["beta"].reshape(1, Dout).astype(jnp.float32)

    out = pl.pallas_call(
        audio_proj_kernel,
        out_shape=jax.ShapeDtypeStruct((B_pad, Dout), jnp.float32),
        grid_spec=pltpu.PrefetchScalarGridSpec(
            num_scalar_prefetch=0,
            grid=grid,
            in_specs=[
                pl.BlockSpec((tb, tk), lambda b, k: (b, k)),       # x tile
                pl.BlockSpec((tk, D1), lambda b, k: (k, 0)),       # W1 tile
                pl.BlockSpec((1, D1), lambda b, k: (0, 0)),        # b1 (resident)
                pl.BlockSpec((D1, D2), lambda b, k: (0, 0)),       # W2 (resident)
                pl.BlockSpec((1, D2), lambda b, k: (0, 0)),        # b2
                pl.BlockSpec((D2, Dout), lambda b, k: (0, 0)),     # W3 (resident)
                pl.BlockSpec((1, Dout), lambda b, k: (0, 0)),      # b3
                pl.BlockSpec((1, Dout), lambda b, k: (0, 0)),      # LN gamma
                pl.BlockSpec((1, Dout), lambda b, k: (0, 0)),      # LN beta
            ],
            out_specs=pl.BlockSpec((tb, Dout), lambda b, k: (b, 0)),
            scratch_shapes=[pltpu.VMEM((tb, D1), jnp.float32)],    # proj1 accumulator
        ),
        compiler_params=pltpu.CompilerParams(
            dimension_semantics=("parallel", "arbitrary"),
            vmem_limit_bytes=32 * 1024 * 1024,
        ),
    )(x_p, w1_p, b1_row, w2_bf, b2_row, w3_bf, b3_row, g_row, beta_row)

    return out[:B]


def init_params(key, input_dim, intermediate_dim, output_dim):
    ks = jax.random.split(key, 8)

    def nrm(k, shape, scale):
        return scale * jax.random.normal(k, shape, jnp.float32)

    return {
        # Linear weights stored as (in, out) so forward is x @ W + b
        # (transpose of PyTorch's (out, in) storage; same math).
        "w1": nrm(ks[0], (input_dim, intermediate_dim), 1.0 / np.sqrt(input_dim)),
        "b1": nrm(ks[1], (intermediate_dim,), 0.02),
        "w2": nrm(ks[2], (intermediate_dim, intermediate_dim),
                  1.0 / np.sqrt(intermediate_dim)),
        "b2": nrm(ks[3], (intermediate_dim,), 0.02),
        "w3": nrm(ks[4], (intermediate_dim, output_dim),
                  1.0 / np.sqrt(intermediate_dim)),
        "b3": nrm(ks[5], (output_dim,), 0.02),
        # LayerNorm affine (PyTorch default init is weight=1, bias=0; perturbed
        # so the affine path is actually exercised).
        "gamma": 1.0 + nrm(ks[6], (output_dim,), 0.05),
        "beta": nrm(ks[7], (output_dim,), 0.05),
    }


def audio_proj_reference(audio_embeds, params):
    """Pure-JAX f32 reference mirroring the PyTorch forward."""
    B = audio_embeds.shape[0]
    x = audio_embeds.reshape(B, -1).astype(jnp.float32)
    h1 = jax.nn.relu(x @ params["w1"] + params["b1"])
    h2 = jax.nn.relu(h1 @ params["w2"] + params["b2"])
    y = h2 @ params["w3"] + params["b3"]
    mean = y.mean(-1, keepdims=True)
    var = ((y - mean) ** 2).mean(-1, keepdims=True)
    y_n = (y - mean) * jax.lax.rsqrt(var + LN_EPS)
    return y_n * params["gamma"] + params["beta"]


if __name__ == "__main__":
    key = jax.random.PRNGKey(0)
    k_x, k_p = jax.random.split(key)

    # Small shapes consistent with the module: (B, seq_len, blocks, channels).
    B, seq_len, blocks, channels = 2, 4, 3, 32          # input_dim = 384
    intermediate_dim, output_dim = 128, 128             # lane-dense small dims

    audio = jax.random.normal(k_x, (B, seq_len, blocks, channels), jnp.float32)
    params = init_params(k_p, seq_len * blocks * channels,
                         intermediate_dim, output_dim)

    # tk=128 -> K grid extent 3, exercising the accumulator path.
    out = audio_proj_forward(audio, params, tk=128, tb=8)
    out = jax.block_until_ready(out)
    assert out.shape == (B, output_dim)

    ref = jax.block_until_ready(audio_proj_reference(audio, params))
    np.testing.assert_allclose(np.asarray(out), np.asarray(ref),
                               rtol=2e-2, atol=2e-2)
    print("KERNEL_OK")
</pallas_src>

<mosaic_0001>
module attributes {stable_mosaic.version = 11 : i64} {
  func.func @audio_proj_kernel(%arg0: i32, %arg1: i32, %arg2: memref<8x128xbf16, #tpu.memory_space<vmem>>, %arg3: memref<128x128xbf16, #tpu.memory_space<vmem>>, %arg4: memref<1x128xf32, #tpu.memory_space<vmem>>, %arg5: memref<128x128xbf16, #tpu.memory_space<vmem>>, %arg6: memref<1x128xf32, #tpu.memory_space<vmem>>, %arg7: memref<128x128xbf16, #tpu.memory_space<vmem>>, %arg8: memref<1x128xf32, #tpu.memory_space<vmem>>, %arg9: memref<1x128xf32, #tpu.memory_space<vmem>>, %arg10: memref<1x128xf32, #tpu.memory_space<vmem>>, %arg11: memref<8x128xf32, #tpu.memory_space<vmem>>, %arg12: memref<8x128xf32, #tpu.memory_space<vmem>>) attributes {dimension_semantics = [#tpu.dimension_semantics<parallel>, #tpu.dimension_semantics<arbitrary>], iteration_bounds = array<i64: 1, 3>, scalar_prefetch = 0 : i64, scratch_operands = 1 : i64, tpu.core_type = #tpu.core_type<tc>, window_params = [{transform_indices = @transform_0, window_bounds = array<i64: 8, 128>}, {transform_indices = @transform_1, window_bounds = array<i64: 128, 128>}, {pipeline_mode = #tpu.pipeline_mode<synchronous>, transform_indices = @transform_2, window_bounds = array<i64: 1, 128>}, {pipeline_mode = #tpu.pipeline_mode<synchronous>, transform_indices = @transform_3, window_bounds = array<i64: 128, 128>}, {pipeline_mode = #tpu.pipeline_mode<synchronous>, transform_indices = @transform_4, window_bounds = array<i64: 1, 128>}, {pipeline_mode = #tpu.pipeline_mode<synchronous>, transform_indices = @transform_5, window_bounds = array<i64: 128, 128>}, {pipeline_mode = #tpu.pipeline_mode<synchronous>, transform_indices = @transform_6, window_bounds = array<i64: 1, 128>}, {pipeline_mode = #tpu.pipeline_mode<synchronous>, transform_indices = @transform_7, window_bounds = array<i64: 1, 128>}, {pipeline_mode = #tpu.pipeline_mode<synchronous>, transform_indices = @transform_8, window_bounds = array<i64: 1, 128>}, {transform_indices = @transform_9, window_bounds = array<i64: 8, 128>}]} {
    %c0_i32 = arith.constant 0 : i32
    %0 = arith.cmpi eq, %arg1, %c0_i32 : i32
    %1 = arith.extui %0 : i1 to i32
    %c0_i32_0 = arith.constant 0 : i32
    %2 = arith.cmpi ne, %1, %c0_i32_0 : i32
    scf.if %2 {
      %cst_9 = arith.constant 0.000000e+00 : f32
      %12 = vector.broadcast %cst_9 : f32 to vector<8x128xf32>
      %c0_10 = arith.constant 0 : index
      %c0_11 = arith.constant 0 : index
      %13 = vector.load %arg12[%c0_10, %c0_11] : memref<8x128xf32, #tpu.memory_space<vmem>>, vector<8x128xf32>
      tpu.vector_store %arg12[%c0_10, %c0_11], %12 {strides = array<i32>} : memref<8x128xf32, #tpu.memory_space<vmem>>, vector<8x128xf32>,
    } else {
    }
    %c0 = arith.constant 0 : index
    %c0_1 = arith.constant 0 : index
    %3 = vector.load %arg12[%c0, %c0_1] : memref<8x128xf32, #tpu.memory_space<vmem>>, vector<8x128xf32>
    %c0_2 = arith.constant 0 : index
    %c0_3 = arith.constant 0 : index
    %4 = vector.load %arg2[%c0_2, %c0_3] : memref<8x128xbf16, #tpu.memory_space<vmem>>, vector<8x128xbf16>
    %c0_4 = arith.constant 0 : index
    %c0_5 = arith.constant 0 : index
    %5 = vector.load %arg3[%c0_4, %c0_5] : memref<128x128xbf16, #tpu.memory_space<vmem>>, vector<128x128xbf16>
    %cst = arith.constant dense<0.000000e+00> : vector<8x128xf32>
    %6 = tpu.matmul %4, %5, %cst {dimension_numbers = #tpu.dot_dimension_numbers<[1], [0], [0], [1], [0, 0, 1, 1], [], []>} : vector<8x128xbf16>, vector<128x128xbf16>, vector<8x128xf32> -> vector<8x128xf32>
    %7 = arith.addf %3, %6 : vector<8x128xf32>
    %c0_6 = arith.constant 0 : index
    %c0_7 = arith.constant 0 : index
    %8 = vector.load %arg12[%c0_6, %c0_7] : memref<8x128xf32, #tpu.memory_space<vmem>>, vector<8x128xf32>
    tpu.vector_store %arg12[%c0_6, %c0_7], %7 {strides = array<i32>} : memref<8x128xf32, #tpu.memory_space<vmem>>, vector<8x128xf32>,
    %c2_i32 = arith.constant 2 : i32
    %9 = arith.cmpi eq, %arg1, %c2_i32 : i32
    %10 = arith.extui %9 : i1 to i32
    %c0_i32_8 = arith.constant 0 : i32
    %11 = arith.cmpi ne, %10, %c0_i32_8 : i32
    scf.if %11 {
      %c0_9 = arith.constant 0 : index
      %c0_10 = arith.constant 0 : index
      %12 = vector.load %arg12[%c0_9, %c0_10] : memref<8x128xf32, #tpu.memory_space<vmem>>, vector<8x128xf32>
      %c0_11 = arith.constant 0 : index
      %c0_12 = arith.constant 0 : index
      %13 = vector.load %arg4[%c0_11, %c0_12] : memref<1x128xf32, #tpu.memory_space<vmem>>, vector<1x128xf32>
      %14 = vector.broadcast %13 : vector<1x128xf32> to vector<8x128xf32>
      %15 = arith.addf %12, %14 : vector<8x128xf32>
      %cst_13 = arith.constant 0.000000e+00 : f32
      %16 = vector.broadcast %cst_13 : f32 to vector<8x128xf32>
      %17 = arith.maximumf %15, %16 : vector<8x128xf32>
      %18 = arith.truncf %17 : vector<8x128xf32> to vector<8x128xbf16>
      %c0_14 = arith.constant 0 : index
      %c0_15 = arith.constant 0 : index
      %19 = vector.load %arg5[%c0_14, %c0_15] : memref<128x128xbf16, #tpu.memory_space<vmem>>, vector<128x128xbf16>
      %cst_16 = arith.constant dense<0.000000e+00> : vector<8x128xf32>
      %20 = tpu.matmul %18, %19, %cst_16 {dimension_numbers = #tpu.dot_dimension_numbers<[1], [0], [0], [1], [0, 0, 1, 1], [], []>} : vector<8x128xbf16>, vector<128x128xbf16>, vector<8x128xf32> -> vector<8x128xf32>
      %c0_17 = arith.constant 0 : index
      %c0_18 = arith.constant 0 : index
      %21 = vector.load %arg6[%c0_17, %c0_18] : memref<1x128xf32, #tpu.memory_space<vmem>>, vector<1x128xf32>
      %22 = vector.broadcast %21 : vector<1x128xf32> to vector<8x128xf32>
      %23 = arith.addf %20, %22 : vector<8x128xf32>
      %cst_19 = arith.constant 0.000000e+00 : f32
      %24 = vector.broadcast %cst_19 : f32 to vector<8x128xf32>
      %25 = arith.maximumf %23, %24 : vector<8x128xf32>
      %26 = arith.truncf %25 : vector<8x128xf32> to vector<8x128xbf16>
      %c0_20 = arith.constant 0 : index
      %c0_21 = arith.constant 0 : index
      %27 = vector.load %arg7[%c0_20, %c0_21] : memref<128x128xbf16, #tpu.memory_space<vmem>>, vector<128x128xbf16>
      %cst_22 = arith.constant dense<0.000000e+00> : vector<8x128xf32>
      %28 = tpu.matmul %26, %27, %cst_22 {dimension_numbers = #tpu.dot_dimension_numbers<[1], [0], [0], [1], [0, 0, 1, 1], [], []>} : vector<8x128xbf16>, vector<128x128xbf16>, vector<8x128xf32> -> vector<8x128xf32>
      %c0_23 = arith.constant 0 : index
      %c0_24 = arith.constant 0 : index
      %29 = vector.load %arg8[%c0_23, %c0_24] : memref<1x128xf32, #tpu.memory_space<vmem>>, vector<1x128xf32>
      %30 = vector.broadcast %29 : vector<1x128xf32> to vector<8x128xf32>
      %31 = arith.addf %28, %30 : vector<8x128xf32>
      %cst_25 = arith.constant dense<0.000000e+00> : vector<8xf32>
      %32 = vector.multi_reduction <add>, %31, %cst_25 [1] : vector<8x128xf32> to vector<8xf32>
      %33 = vector.shape_cast %32 : vector<8xf32> to vector<8x1xf32>
      %cst_26 = arith.constant 1.280000e+02 : f32
      %34 = vector.broadcast %cst_26 : f32 to vector<8x1xf32>
      %35 = arith.divf %33, %34 : vector<8x1xf32>
      %36 = vector.broadcast %35 : vector<8x1xf32> to vector<8x128xf32>
      %37 = arith.subf %31, %36 : vector<8x128xf32>
      %38 = arith.mulf %37, %37 : vector<8x128xf32>
      %cst_27 = arith.constant dense<0.000000e+00> : vector<8xf32>
      %39 = vector.multi_reduction <add>, %38, %cst_27 [1] : vector<8x128xf32> to vector<8xf32>
      %40 = vector.shape_cast %39 : vector<8xf32> to vector<8x1xf32>
      %cst_28 = arith.constant 1.280000e+02 : f32
      %41 = vector.broadcast %cst_28 : f32 to vector<8x1xf32>
      %42 = arith.divf %40, %41 : vector<8x1xf32>
      %43 = vector.broadcast %35 : vector<8x1xf32> to vector<8x128xf32>
      %44 = arith.subf %31, %43 : vector<8x128xf32>
      %cst_29 = arith.constant 9.99999974E-6 : f32
      %45 = vector.broadcast %cst_29 : f32 to vector<8x1xf32>
      %46 = arith.addf %42, %45 : vector<8x1xf32>
      %47 = math.rsqrt %46 : vector<8x1xf32>
      %48 = vector.broadcast %47 : vector<8x1xf32> to vector<8x128xf32>
      %49 = arith.mulf %44, %48 : vector<8x128xf32>
      %c0_30 = arith.constant 0 : index
      %c0_31 = arith.constant 0 : index
      %50 = vector.load %arg9[%c0_30, %c0_31] : memref<1x128xf32, #tpu.memory_space<vmem>>, vector<1x128xf32>
      %51 = vector.broadcast %50 : vector<1x128xf32> to vector<8x128xf32>
      %52 = arith.mulf %49, %51 : vector<8x128xf32>
      %c0_32 = arith.constant 0 : index
      %c0_33 = arith.constant 0 : index
      %53 = vector.load %arg10[%c0_32, %c0_33] : memref<1x128xf32, #tpu.memory_space<vmem>>, vector<1x128xf32>
      %54 = vector.broadcast %53 : vector<1x128xf32> to vector<8x128xf32>
      %55 = arith.addf %52, %54 : vector<8x128xf32>
      %c0_34 = arith.constant 0 : index
      %c0_35 = arith.constant 0 : index
      %56 = vector.load %arg11[%c0_34, %c0_35] : memref<8x128xf32, #tpu.memory_space<vmem>>, vector<8x128xf32>
      tpu.vector_store %arg11[%c0_34, %c0_35], %55 {strides = array<i32>} : memref<8x128xf32, #tpu.memory_space<vmem>>, vector<8x128xf32>,
    } else {
    }
    return
  }
  func.func @transform_0(%arg0: i32, %arg1: i32) -> (i32, i32) {
    %c0_i32 = arith.constant 0 : i32
    return %arg0, %arg1 : i32, i32
  }
  func.func @transform_1(%arg0: i32, %arg1: i32) -> (i32, i32) {
    %c0_i32 = arith.constant 0 : i32
    %c0_i32_0 = arith.constant 0 : i32
    return %arg1, %c0_i32 : i32, i32
  }
  func.func @transform_2(%arg0: i32, %arg1: i32) -> (i32, i32) {
    %c0_i32 = arith.constant 0 : i32
    %c0_i32_0 = arith.constant 0 : i32
    %c0_i32_1 = arith.constant 0 : i32
    return %c0_i32, %c0_i32_0 : i32, i32
  }
  func.func @transform_3(%arg0: i32, %arg1: i32) -> (i32, i32) {
    %c0_i32 = arith.constant 0 : i32
    %c0_i32_0 = arith.constant 0 : i32
    %c0_i32_1 = arith.constant 0 : i32
    return %c0_i32, %c0_i32_0 : i32, i32
  }
  func.func @transform_4(%arg0: i32, %arg1: i32) -> (i32, i32) {
    %c0_i32 = arith.constant 0 : i32
    %c0_i32_0 = arith.constant 0 : i32
    %c0_i32_1 = arith.constant 0 : i32
    return %c0_i32, %c0_i32_0 : i32, i32
  }
  func.func @transform_5(%arg0: i32, %arg1: i32) -> (i32, i32) {
    %c0_i32 = arith.constant 0 : i32
    %c0_i32_0 = arith.constant 0 : i32
    %c0_i32_1 = arith.constant 0 : i32
    return %c0_i32, %c0_i32_0 : i32, i32
  }
  func.func @transform_6(%arg0: i32, %arg1: i32) -> (i32, i32) {
    %c0_i32 = arith.constant 0 : i32
    %c0_i32_0 = arith.constant 0 : i32
    %c0_i32_1 = arith.constant 0 : i32
    return %c0_i32, %c0_i32_0 : i32, i32
  }
  func.func @transform_7(%arg0: i32, %arg1: i32) -> (i32, i32) {
    %c0_i32 = arith.constant 0 : i32
    %c0_i32_0 = arith.constant 0 : i32
    %c0_i32_1 = arith.constant 0 : i32
    return %c0_i32, %c0_i32_0 : i32, i32
  }
  func.func @transform_8(%arg0: i32, %arg1: i32) -> (i32, i32) {
    %c0_i32 = arith.constant 0 : i32
    %c0_i32_0 = arith.constant 0 : i32
    %c0_i32_1 = arith.constant 0 : i32
    return %c0_i32, %c0_i32_0 : i32, i32
  }
  func.func @transform_9(%arg0: i32, %arg1: i32) -> (i32, i32) {
    %c0_i32 = arith.constant 0 : i32
    %c0_i32_0 = arith.constant 0 : i32
    return %arg0, %c0_i32 : i32, i32
  }
}

</mosaic_0001>

<bundles_post_ra>
// kernel: audio_proj_forward.1
= control target key start
LH: loop header
LB: loop body
LE: loop exit
PB: predicated region body
PF: predicated region fallthrough
CT: control target
= control target key end

     0   :  { %s1097_s30 = smov 0   ;;  %s1099_s10 = smov 0   ;;  %s1206_s0 = inlined_call_operand.vmem [shape: bf16[8,384], index: 0, kind: input, shape index: {}]   ;;  %s1207_s1 = inlined_call_operand.vmem [shape: bf16[384,128], index: 1, kind: input, shape index: {}]   ;;  %s1208_s2 = inlined_call_operand.vmem [shape: f32[1,128], index: 2, kind: input, shape index: {}]   ;;  %s1209_s3 = inlined_call_operand.vmem [shape: bf16[128,128], index: 3, kind: input, shape index: {}]   ;;  %s1210_s4 = inlined_call_operand.vmem [shape: f32[1,128], index: 4, kind: input, shape index: {}]   ;;  %s1211_s5 = inlined_call_operand.vmem [shape: bf16[128,128], index: 5, kind: input, shape index: {}]   ;;  %s1212_s6 = inlined_call_operand.vmem [shape: f32[1,128], index: 6, kind: input, shape index: {}]   ;;  %s1213_s7 = inlined_call_operand.vmem [shape: f32[1,128], index: 7, kind: input, shape index: {}]   ;;  %s1214_s8 = inlined_call_operand.vmem [shape: f32[1,128], index: 8, kind: input, shape index: {}]   ;;  %s1215_s9 = inlined_call_operand.vmem [shape: f32[8,128], index: 9, kind: output, shape index: {}]  }
   0x1   :  { %s1101_s11 = smov 0  }
   0x2 LB: > { %s28_s12 = sadd.s32 1, %s1036_s10  ;;  %p838_p0 = scmp.ge.s32.totalorder %s1040_s11, 1  ;;  %s1040_s11 = sphi %s1101_s11, %s19_s11   ;;  %s1036_s10 = sphi %s1099_s10, %s1217_s10   ;;  %s1032_s30 = sphi %s1097_s30, %s1216_s30  }
   0x3   : > { %p29_p1 = scmp.ge.s32.totalorder %s28_s12, 3  ;;  %p315_p2 = scmp.lt.s32.totalorder %s1040_s11, 4 }
   0x5   : > { %s1219_s12 = smov (%p29_p1, %s28_s12), 0  ;;  %p316_p3 = pnand %p838_p0, %p315_p2 }
   0x6   : > { %p360_p4 = scmp.lt.s32.totalorder (!%p316_p3), %s1032_s30, 2  ;;  %s840_s13 = sshll.u32 (!%p316_p3), %s1032_s30, 4 }
   0x7   : > { %319 = sbr.rel (%p316_p3) target bundleno = 1027 (0x403), region = 56  ;;  %p367_p5 = scmp.lt.s32.totalorder (!%p316_p3), %s840_s13, 47 }
   0x8   : > { %p842_p6 = scmp.ne.s32.totalorder (!%p316_p3), %s1032_s30, 0 }
   0xe   : > { %s361_s14 = scalar_select %p360_p4, %s1032_s30, 2 }
   0xf   : > { %s1221_s13 = smov (!%p367_p5, %s840_s13), 47  ;;  %380 = sbr.rel (%p842_p6) target bundleno = 22 (0x16), region = 60 }
  0x10   : > { %s839_s15 = sshll.u32 %s361_s14, 2  ;;  %s841_s19 = sshll.u32 %s1221_s13, 2  ;;  %v1042_v0 = vmov (!%p842_p6), 0.0  }
  0x11   : > { %s1123_s18 = scalar_lea.vmem %s1206_s0, %s839_s15  ;;  %s370_s22 = scalar_lea.vmem %s1207_s1, %s841_s19  ;;  %381 = vst [vmem:[#allocation2] sm:$0xff] (!%p842_p6), %v1042_v0 }
  0x16 PF: > { %v992_v1 = vld [vmem:[%s370_s22] sm:$0xff]   ;;  %v1043_v2 = vmov 0.0   ;;  %v993_v3 = vld [vmem:[%s370_s22 + $0x8] sm:$0xff]   ;;  %vm1044_vm0 = vmmov 0   ;;  %v994_v4 = vld [vmem:[%s370_s22 + $0x10] sm:$0xff]   ;;  %p851_p7 = scmp.ne.s32.totalorder %s1032_s30, 2 }
  0x17   : > { %903 = vmatprep.subr.bf16.mxu0 %v1043_v2  ;;  %919 = vmatprep.mubr.msk.bf16.mxu0 %vm1044_vm0, %v1043_v2  ;;  %v995_v5 = vld [vmem:[%s370_s22 + $0x18] sm:$0xff]   ;;  %v996_v6 = vld [vmem:[%s370_s22 + $0x20] sm:$0xff]   ;;  %v997_v7 = vld [vmem:[%s370_s22 + $0x28] sm:$0xff]   ;;  %v1045_v18 = vmov (!%p851_p7), 0.0   ;;  %vm1046_vm1 = vmmov (!%p851_p7), 0  }
  0x18   : > { %904 = vmatpush3.bf16.msra.mxu0 %v992_v1  ;;  %v998_v8 = vld [vmem:[%s370_s22 + $0x30] sm:$0xff]   ;;  %v999_v9 = vld [vmem:[%s370_s22 + $0x38] sm:$0xff]   ;;  %v383_v10 = vld [vmem:[%s1123_s18] sm:$0xf]  ;;  %943 = vmatprep.subr.bf16.mxu1 (!%p851_p7), %v1045_v18 }
  0x19   : > { %905 = vmatprep.subr.bf16.mxu0 %v1043_v2  ;;  %v382_v11 = vld [vmem:[#allocation2] sm:$0xff]  ;;  %v1001_v19 = vld [vmem:[%s1209_s3 + $0x8] sm:$0xff] (!%p851_p7)   ;;  %959 = vmatprep.mubr.msk.bf16.mxu1 (!%p851_p7), %vm1046_vm1, %v1045_v18  ;;  %v1002_v20 = vld [vmem:[%s1209_s3 + $0x10] sm:$0xff] (!%p851_p7)  }
  0x1a   : > { %v1000_v17 = vld [vmem:[%s1209_s3] sm:$0xff] (!%p851_p7)   ;;  %v1003_v22 = vld [vmem:[%s1209_s3 + $0x18] sm:$0xff] (!%p851_p7)   ;;  %v1009_v23 = vld [vmem:[%s1211_s5 + $0x8] sm:$0xff] (!%p851_p7)  }
  0x1b   : > { %v1008_v21 = vld [vmem:[%s1211_s5] sm:$0xff] (!%p851_p7)   ;;  %v1010_v25 = vld [vmem:[%s1211_s5 + $0x10] sm:$0xff] (!%p851_p7)   ;;  %v1005_v26 = vld [vmem:[%s1209_s3 + $0x28] sm:$0xff] (!%p851_p7)  }
  0x1c   : > { %906 = vmatpush3.bf16.msra.mxu0 %v993_v3  ;;  %944 = vmatpush3.bf16.msra.mxu1 (!%p851_p7), %v1008_v21  ;;  %v1004_v24 = vld [vmem:[%s1209_s3 + $0x20] sm:$0xff] (!%p851_p7)   ;;  %v1011_v29 = vld [vmem:[%s1211_s5 + $0x18] sm:$0xff] (!%p851_p7)   ;;  %v1006_v31 = vld [vmem:[%s1209_s3 + $0x30] sm:$0xff] (!%p851_p7)  }
  0x1d   : > { %907 = vmatprep.subr.bf16.mxu0 %v1043_v2  ;;  %945 = vmatprep.subr.bf16.mxu1 (!%p851_p7), %v1045_v18  ;;  %v852_v28 = vld [vmem:[%s1208_s2] ss:$0 sm:$0xff] (!%p851_p7)  ;;  %v1007_v34 = vld [vmem:[%s1209_s3 + $0x38] sm:$0xff] (!%p851_p7)   ;;  %v1013_v35 = vld [vmem:[%s1211_s5 + $0x28] sm:$0xff] (!%p851_p7)  }
  0x1e   : > { %v1012_v32 = vld [vmem:[%s1211_s5 + $0x20] sm:$0xff] (!%p851_p7)   ;;  %v1014_v37 = vld [vmem:[%s1211_s5 + $0x30] sm:$0xff] (!%p851_p7)   ;;  %v1015_v38 = vld [vmem:[%s1211_s5 + $0x38] sm:$0xff] (!%p851_p7)  }
  0x1f   : > { %v853_v39 = vld [vmem:[%s1210_s4] ss:$0 sm:$0xff] (!%p851_p7) }
  0x20   : > { %908 = vmatpush3.bf16.msra.mxu0 %v994_v4  ;;  %946 = vmatpush3.bf16.msra.mxu1 (!%p851_p7), %v1009_v23  ;;  %v862_v47 = vld [vmem:[%s1212_s6] ss:$0 sm:$0xff] (!%p851_p7) }
  0x21   : > { %909 = vmatprep.subr.bf16.mxu0 %v1043_v2  ;;  %947 = vmatprep.subr.bf16.mxu1 (!%p851_p7), %v1045_v18  ;;  %v871_v61 = vld [vmem:[%s1213_s7] ss:$0 sm:$0xff] (!%p851_p7) }
  0x22   : > { %v872_v63 = vld [vmem:[%s1214_s8] ss:$0 sm:$0xff] (!%p851_p7) }
  0x24   : > { %910 = vmatpush3.bf16.msra.mxu0 %v995_v5  ;;  %948 = vmatpush3.bf16.msra.mxu1 (!%p851_p7), %v1010_v25 }
  0x25   : > { %911 = vmatprep.subr.bf16.mxu0 %v1043_v2  ;;  %949 = vmatprep.subr.bf16.mxu1 (!%p851_p7), %v1045_v18 }
  0x28   : > { %912 = vmatpush3.bf16.msra.mxu0 %v996_v6  ;;  %950 = vmatpush3.bf16.msra.mxu1 (!%p851_p7), %v1011_v29 }
  0x29   : > { %913 = vmatprep.subr.bf16.mxu0 %v1043_v2  ;;  %951 = vmatprep.subr.bf16.mxu1 (!%p851_p7), %v1045_v18 }
  0x2c   : > { %914 = vmatpush3.bf16.msra.mxu0 %v997_v7  ;;  %952 = vmatpush3.bf16.msra.mxu1 (!%p851_p7), %v1012_v32 }
  0x2d   : > { %915 = vmatprep.subr.bf16.mxu0 %v1043_v2  ;;  %953 = vmatprep.subr.bf16.mxu1 (!%p851_p7), %v1045_v18 }
  0x30   : > { %916 = vmatpush3.bf16.msra.mxu0 %v998_v8  ;;  %954 = vmatpush3.bf16.msra.mxu1 (!%p851_p7), %v1013_v35 }
  0x31   : > { %917 = vmatprep.subr.bf16.mxu0 %v1043_v2  ;;  %955 = vmatprep.subr.bf16.mxu1 (!%p851_p7), %v1045_v18 }
  0x34   : > { %918 = vmatpush3.bf16.msra.mxu0 %v999_v9  ;;  %956 = vmatpush3.bf16.msra.mxu1 (!%p851_p7), %v1014_v37 }
  0x35   : > { %923 = vmatprep.subr.bf16.mxu0 (!%p851_p7), %v1045_v18  ;;  %957 = vmatprep.subr.bf16.mxu1 (!%p851_p7), %v1045_v18 }
  0x37   : > { %920 = vmatmul.mubr.bf16.vlgmr.msra.gmra.mrb[0].mxu0 %v383_v10 }
  0x38   : > { %924 = vmatpush3.bf16.msra.mxu0 (!%p851_p7), %v1000_v17  ;;  %939 = vmatprep.mubr.msk.bf16.mxu0 (!%p851_p7), %vm1046_vm1, %v1045_v18 }
  0x39   : > { %925 = vmatprep.subr.bf16.mxu0 (!%p851_p7), %v1045_v18  ;;  %958 = vmatpush3.bf16.msra.mxu1 (!%p851_p7), %v1015_v38 }
  0x3c   : > { %926 = vmatpush3.bf16.msra.mxu0 (!%p851_p7), %v1001_v19 }
  0x3d   : > { %927 = vmatprep.subr.bf16.mxu0 (!%p851_p7), %v1045_v18 }
  0x40   : > { %928 = vmatpush3.bf16.msra.mxu0 (!%p851_p7), %v1002_v20 }
  0x41   : > { %929 = vmatprep.subr.bf16.mxu0 (!%p851_p7), %v1045_v18 }
  0x44   : > { %930 = vmatpush3.bf16.msra.mxu0 (!%p851_p7), %v1003_v22 }
  0x45   : > { %931 = vmatprep.subr.bf16.mxu0 (!%p851_p7), %v1045_v18 }
  0x48   : > { %932 = vmatpush3.bf16.msra.mxu0 (!%p851_p7), %v1004_v24 }
  0x49   : > { %933 = vmatprep.subr.bf16.mxu0 (!%p851_p7), %v1045_v18 }
  0x4c   : > { %934 = vmatpush3.bf16.msra.mxu0 (!%p851_p7), %v1005_v26 }
  0x4d   : > { %935 = vmatprep.subr.bf16.mxu0 (!%p851_p7), %v1045_v18 }
  0x50   : > { %936 = vmatpush3.bf16.msra.mxu0 (!%p851_p7), %v1006_v31 }
  0x51   : > { %937 = vmatprep.subr.bf16.mxu0 (!%p851_p7), %v1045_v18 }
  0x54   : > { %938 = vmatpush3.bf16.msra.mxu0 (!%p851_p7), %v1007_v34 }
 0x107   : > { %493 = sbr.rel (%p851_p7) target bundleno = 1027 (0x403), region = 64 }
 0x10a   : > { %v482_v12 = vpop.f32.mrb[0].mxu0 }
 0x10b   : > { %v488_v13 = vadd.f32 %v482_v12, %v382_v11  ;;  %v921_v14 = vpop.f32.mrb[1].mxu0 }
 0x10c   : > { %v485_v15 = vpop.f32.mrb[2].mxu0 }
 0x10d   : > { %489 = vst [vmem:[#allocation2] sm:$0xff] %v488_v13  ;;  %v922_v16 = vpop.f32.mrb[3].mxu0 }
 0x114   : > { %v494_v27 = vld [vmem:[#allocation2] sm:$0xff] }
 0x115   : > { %v502_v30 = vadd.f32 %v852_v28, %v494_v27 }
 0x117   : > { %v503_v33 = vmax.f32 %v502_v30, 0.0 }
 0x119   : > { %v504_v36 = vpack.c.bf16 %v503_v33, %v503_v33 }
 0x11b   : > { %940 = vmatmul.mubr.bf16.vlgmr.msra.gmra.mrb[0].mxu0 %v504_v36 }
 0x1ee   : > { %v610_v40 = vpop.f32.mrb[0].mxu0 }
 0x1ef   : > { %v611_v41 = vadd.f32 %v853_v39, %v610_v40  ;;  %v941_v42 = vpop.f32.mrb[1].mxu0 }
 0x1f0   : > { %v613_v43 = vpop.f32.mrb[2].mxu0 }
 0x1f1   : > { %v616_v44 = vmax.f32 %v611_v41, 0.0  ;;  %v942_v45 = vpop.f32.mrb[3].mxu0 }
 0x1f3   : > { %v617_v46 = vpack.c.bf16 %v616_v44, %v616_v44 }
 0x1f5   : > { %960 = vmatmul.mubr.bf16.vlgmr.msra.gmra.mrb[0].mxu1 %v617_v46 }
 0x2c8   : > { %v723_v48 = vpop.f32.mrb[0].mxu1 }
 0x2c9   : > { %v724_v49 = vadd.f32 %v862_v47, %v723_v48  ;;  %v961_v50 = vpop.f32.mrb[1].mxu1 }
 0x2ca   : > { %v726_v51 = vpop.f32.mrb[2].mxu1 }
 0x2cb   : > { %729 = vadd.xlane.f32.xlu0 %v724_v49  ;;  %v962_v52 = vpop.f32.mrb[3].mxu1 }
 0x358   : > { %v730_v53 = vpop.xlane.xlu0 %729 }
 0x359   : > { %v732_v54 = vmul.f32 0.0078125, %v730_v53 }
 0x35b   : > { %v733_v55 = vsub.f32 %v724_v49, %v732_v54 }
 0x35d   : > { %v734_v56 = vmul.f32 %v733_v55, %v733_v55 }
 0x35f   : > { %735 = vadd.xlane.f32.xlu0 %v734_v56 }
 0x3ec   : > { %v736_v57 = vpop.xlane.xlu0 %735 }
 0x3ed   : > { %v737_v58 = vmul.f32 0.0078125, %v736_v57 }
 0x3ef   : > { %v738_v59 = vadd.f32 1e-05, %v737_v58 }
 0x3f1   : > { %1016 = vrsqrt.f32 %v738_v59 }
 0x3fb   : > { %v1017_v60 = vpop.eup %1016 }
 0x3fc   : > { %v740_v62 = vmul.f32 %v1017_v60, %v733_v55 }
 0x3fe   : > { %v748_v0 = vmul.f32 %v871_v61, %v740_v62 }
 0x400   : > { %v756_v1 = vadd.f32 %v872_v63, %v748_v0 }
 0x402   : > { %757 = vst [vmem:[%s1215_s9] sm:$0xff] %v756_v1 }
 0x403 PF: > { %s19_s11 = sadd.s32 1, %s1040_s11   ;;  %s1216_s30 = smov %s1036_s10 }
 0x404   : > { %p16_p8 = scmp.ge.s32.totalorder %s19_s11, 5   ;;  %s1217_s10 = smov %s1219_s12 }
 0x406   :  { %18 = sbr.rel (!%p16_p8) target bundleno = 2 (0x2), region = 97 }

</bundles_post_ra>
